<compile_context>
chip_gen: v6e
topology: v6e:2x2x1
jax: 0.10.0
libtpu: 0.0.40
codegen_flags: <defaults>
</compile_context>

<pallas_src>
import numpy as np
import jax
import jax.numpy as jnp
from jax import lax
from jax.experimental import pallas as pl
from jax.experimental.pallas import tpu as pltpu


def _basic_block_kernel(x_ref, w1_ref, w2_ref, bias_ref, out_ref):
    """Fused BasicBlock for Nb batch elements per grid step.

    x_ref   : (Nb, H, W*C) f32   lane-dense input, lane index = w*C + c
    w1_ref  : (3*W*C, W*C) bf16  banded conv1 weights (BN1 scale folded in)
    w2_ref  : (3*W*C, W*C) bf16  banded conv2 weights (BN2 scale folded in)
    bias_ref: (2, W*C)     f32   row 0 = BN1 bias, row 1 = BN2 bias (tiled over w)
    out_ref : (Nb, H, W*C) f32
    """
    Nb, H, WC = x_ref.shape
    M = Nb * H

    # Packed activations: row r = b*H + h.
    x = x_ref[...].reshape(M, WC)

    # Per-image border-row masks (computed once, reused by both stages).
    # They zero the kh=-1 tap at h == 0 and the kh=+1 tap at h == H-1, which
    # also prevents the circular roll from bleeding rows across batch
    # elements inside the packed LHS.
    h_idx = lax.broadcasted_iota(jnp.int32, (M, WC), 0) % H
    not_top = h_idx != 0
    not_bot = h_idx != (H - 1)

    def conv_lhs(a):
        # (M, 3*W*C) matmul LHS: [rows h-1 | rows h | rows h+1].  Row shifts
        # ride the XLU (pltpu.roll) instead of a VMEM scratch round-trip; the
        # W halo is encoded in the banded weights.  bf16 operands -> native
        # MXU passes; accumulation stays f32.
        up = jnp.where(not_top, pltpu.roll(a, shift=1, axis=0), 0.0)
        dn = jnp.where(not_bot, pltpu.roll(a, shift=M - 1, axis=0), 0.0)
        return jnp.concatenate([up, a, dn], axis=1).astype(jnp.bfloat16)

    # Stage 1: conv3x3 + BN1 + Hardtanh(0, 20) — one K = 3*W*C MXU matmul.
    h1 = jnp.dot(conv_lhs(x), w1_ref[...], preferred_element_type=jnp.float32)
    h1 = jnp.clip(h1 + bias_ref[0:1, :], 0.0, 20.0)

    # Stage 2: conv3x3 + BN2 + residual + Hardtanh(0, 20).
    y = jnp.dot(conv_lhs(h1), w2_ref[...], preferred_element_type=jnp.float32)
    y = jnp.clip(y + bias_ref[1:2, :] + x, 0.0, 20.0)
    out_ref[...] = y.reshape(Nb, H, WC)


def _fold_bn(gamma, beta, mean, var, eps=1e-5):
    s = gamma * lax.rsqrt(var + eps)
    return s, beta - mean * s


def _banded_weights(w_hwio, width):
    """(3, 3, Cin, Cout) conv weights -> (3*width*Cin, width*Cout) banded matrix.

    Row index = kh*(width*Cin) + wp*Cin + ci, col index = w*Cout + co,
    entry = w_hwio[kh, wp - w + 1, ci, co] if wp - w + 1 in {0,1,2} else 0,
    so that (row-shifted lane-dense activations) @ B equals the 3x3 "same"
    convolution output in the same lane-dense (w, c) layout.
    """
    Cin, Cout = w_hwio.shape[2], w_hwio.shape[3]
    wp = jnp.arange(width)[:, None]
    w = jnp.arange(width)[None, :]
    kw = wp - w + 1                                              # (W, W)
    valid = ((kw >= 0) & (kw <= 2)).astype(w_hwio.dtype)
    taps = jnp.take(w_hwio, jnp.clip(kw, 0, 2), axis=1)          # (3, W, W, Cin, Cout)
    taps = taps * valid[None, :, :, None, None]
    return jnp.transpose(taps, (0, 1, 3, 2, 4)).reshape(3 * width * Cin,
                                                        width * Cout)


def _pick_batch_block(N, H, target_rows=256):
    """Largest divisor of N with Nb*H <= target_rows (fill the MXU M dim up to
    the 256-row v6e/v7x systolic array); if that leaves a single grid step and
    halving still keeps M >= 128, halve it so v7x's two cores get work."""
    cap = max(1, target_rows // H)
    nb = max(1, min(N, cap))
    while N % nb:
        nb -= 1
    if N // nb == 1 and nb % 2 == 0 and (nb // 2) * H >= 128:
        nb //= 2
    return nb


def basic_block_forward(x_nchw, params, *, batch_block=None):
    """BasicBlock forward. x_nchw: (N, C, H, W) float32 -> (N, C, H, W)."""
    N, C, H, W = x_nchw.shape
    Cout = params["w1"].shape[-1]
    assert Cout == C, "identity shortcut requires Cin == Cout"
    WC = W * C

    # NCHW -> lane-dense (N, H, W*C); lane index = w*C + c.
    x2d = jnp.transpose(x_nchw, (0, 2, 3, 1)).reshape(N, H, WC)

    s1, beta1 = _fold_bn(params["bn1_gamma"], params["bn1_beta"],
                         params["bn1_mean"], params["bn1_var"])
    s2, beta2 = _fold_bn(params["bn2_gamma"], params["bn2_beta"],
                         params["bn2_mean"], params["bn2_var"])

    # Fold BN scales into the conv weights, expand each 3x3 conv into a banded
    # matmul operand, and cast to bf16 (MXU-native, halves weight DMA bytes;
    # in-kernel accumulation stays f32).
    w1b = _banded_weights(params["w1"] * s1[None, None, None, :], W).astype(jnp.bfloat16)
    w2b = _banded_weights(params["w2"] * s2[None, None, None, :], W).astype(jnp.bfloat16)
    bias = jnp.stack([jnp.tile(beta1, W), jnp.tile(beta2, W)], axis=0)  # (2, W*Cout) f32

    Nb = batch_block if batch_block is not None else _pick_batch_block(N, H)
    assert N % Nb == 0

    out2d = pl.pallas_call(
        _basic_block_kernel,
        out_shape=jax.ShapeDtypeStruct((N, H, WC), jnp.float32),
        grid=(N // Nb,),
        in_specs=[
            pl.BlockSpec((Nb, H, WC), lambda n: (n, 0, 0)),
            pl.BlockSpec((3 * WC, WC), lambda n: (0, 0)),
            pl.BlockSpec((3 * WC, WC), lambda n: (0, 0)),
            pl.BlockSpec((2, WC), lambda n: (0, 0)),
        ],
        out_specs=pl.BlockSpec((Nb, H, WC), lambda n: (n, 0, 0)),
        # Each x block is fully consumed before the output writeback: reuse
        # its HBM buffer for the output (saves one full-activation allocation).
        input_output_aliases={0: 0},
        compiler_params=pltpu.CompilerParams(
            dimension_semantics=("parallel",)),
    )(x2d, w1b, w2b, bias)

    return jnp.transpose(out2d.reshape(N, H, W, Cout), (0, 3, 1, 2))


def _reference_forward(x_nchw, params):
    """Pure-JAX reference (f32, HIGHEST precision) for correctness checking."""
    x = jnp.transpose(x_nchw, (0, 2, 3, 1))

    def conv(a, w):
        return lax.conv_general_dilated(
            a, w, window_strides=(1, 1), padding="SAME",
            dimension_numbers=("NHWC", "HWIO", "NHWC"),
            precision=lax.Precision.HIGHEST)

    def bn(y, g, b, m, v, eps=1e-5):
        return (y - m) * (g * lax.rsqrt(v + eps)) + b

    h = jnp.clip(bn(conv(x, params["w1"]), params["bn1_gamma"],
                    params["bn1_beta"], params["bn1_mean"], params["bn1_var"]),
                 0.0, 20.0)
    o = bn(conv(h, params["w2"]), params["bn2_gamma"], params["bn2_beta"],
           params["bn2_mean"], params["bn2_var"]) + x
    return jnp.transpose(jnp.clip(o, 0.0, 20.0), (0, 3, 1, 2))


def init_params(inplanes, planes, key):
    k1, k2 = jax.random.split(key)
    fan1 = 3 * 3 * inplanes
    fan2 = 3 * 3 * planes
    c = jnp.arange(planes, dtype=jnp.float32)
    return {
        # conv weights in HWIO layout (3, 3, Cin, Cout)
        "w1": jax.random.normal(k1, (3, 3, inplanes, planes), jnp.float32)
              * np.sqrt(2.0 / fan1),
        "w2": jax.random.normal(k2, (3, 3, planes, planes), jnp.float32)
              * np.sqrt(2.0 / fan2),
        # BatchNorm (eval-mode) parameters, deterministic and non-trivial
        "bn1_gamma": 1.0 + 0.05 * c, "bn1_beta": 0.02 * c,
        "bn1_mean": 0.01 * c, "bn1_var": 1.0 + 0.03 * c,
        "bn2_gamma": 1.0 - 0.02 * c, "bn2_beta": -0.01 * c,
        "bn2_mean": -0.02 * c, "bn2_var": 1.0 + 0.01 * c,
    }


if __name__ == "__main__":
    # inplanes = planes = 8, stride=1, downsample=None; W*C = 128 lanes,
    # batch of 8 so one grid step packs M = Nb*H = 128 matmul rows.
    N, C, H, W = 8, 8, 16, 16
    key = jax.random.PRNGKey(0)
    kx, kp = jax.random.split(key)
    x = jax.random.normal(kx, (N, C, H, W), jnp.float32)
    params = init_params(C, C, kp)

    out = jax.block_until_ready(jax.jit(basic_block_forward)(x, params))
    ref = jax.block_until_ready(_reference_forward(x, params))

    # bf16 MXU operands with f32 accumulation vs. an f32 HIGHEST-precision
    # reference -> loosened tolerance (per review).
    np.testing.assert_allclose(np.asarray(out), np.asarray(ref),
                               rtol=5e-2, atol=5e-2)
    assert out.shape == (N, C, H, W)
    print("KERNEL_OK")
</pallas_src>

<mosaic_0001>
module attributes {stable_mosaic.version = 11 : i64} {
  func.func @_basic_block_kernel(%arg0: i32, %arg1: memref<8x16x128xf32, #tpu.memory_space<vmem>>, %arg2: memref<384x128xbf16, #tpu.memory_space<vmem>>, %arg3: memref<384x128xbf16, #tpu.memory_space<vmem>>, %arg4: memref<2x128xf32, #tpu.memory_space<vmem>>, %arg5: memref<8x16x128xf32, #tpu.memory_space<vmem>>) attributes {dimension_semantics = [#tpu.dimension_semantics<parallel>], iteration_bounds = array<i64: 1>, scalar_prefetch = 0 : i64, scratch_operands = 0 : i64, tpu.core_type = #tpu.core_type<tc>, window_params = [{transform_indices = @transform_0, window_bounds = array<i64: 8, 16, 128>}, {pipeline_mode = #tpu.pipeline_mode<synchronous>, transform_indices = @transform_1, window_bounds = array<i64: 384, 128>}, {pipeline_mode = #tpu.pipeline_mode<synchronous>, transform_indices = @transform_2, window_bounds = array<i64: 384, 128>}, {pipeline_mode = #tpu.pipeline_mode<synchronous>, transform_indices = @transform_3, window_bounds = array<i64: 2, 128>}, {transform_indices = @transform_4, window_bounds = array<i64: 8, 16, 128>}]} {
    %c0 = arith.constant 0 : index
    %c0_0 = arith.constant 0 : index
    %c0_1 = arith.constant 0 : index
    %0 = vector.load %arg1[%c0, %c0_0, %c0_1] : memref<8x16x128xf32, #tpu.memory_space<vmem>>, vector<8x16x128xf32>
    %1 = vector.shape_cast %0 : vector<8x16x128xf32> to vector<128x128xf32>
    %2 = tpu.iota {dimensions = array<i32: 0>} : vector<128x128xi32>
    %c16_i32 = arith.constant 16 : i32
    %c0_i32 = arith.constant 0 : i32
    %3 = arith.cmpi eq, %c16_i32, %c0_i32 : i32
    %c1_i32 = arith.constant 1 : i32
    %4 = arith.select %3, %c1_i32, %c16_i32 : i32
    %5 = vector.broadcast %4 : i32 to vector<128x128xi32>
    %6 = arith.remsi %2, %5 : vector<128x128xi32>
    %c0_i32_2 = arith.constant 0 : i32
    %7 = vector.broadcast %c0_i32_2 : i32 to vector<128x128xi32>
    %8 = arith.cmpi ne, %6, %7 : vector<128x128xi32>
    %c0_i32_3 = arith.constant 0 : i32
    %9 = vector.broadcast %c0_i32_3 : i32 to vector<128x128xi32>
    %10 = arith.cmpi slt, %6, %9 : vector<128x128xi32>
    %c0_i32_4 = arith.constant 0 : i32
    %11 = arith.cmpi slt, %4, %c0_i32_4 : i32
    %12 = vector.broadcast %11 : i1 to vector<128x128xi1>
    %13 = vector.broadcast %12 : vector<128x128xi1> to vector<128x128xi1>
    %14 = arith.xori %10, %13 : vector<128x128xi1>
    %15 = arith.andi %14, %8 : vector<128x128xi1>
    %16 = vector.broadcast %4 : i32 to vector<128x128xi32>
    %17 = arith.addi %6, %16 : vector<128x128xi32>
    %18 = arith.select %15, %17, %6 : vector<128x128xi1>, vector<128x128xi32>
    %c0_i32_5 = arith.constant 0 : i32
    %19 = vector.broadcast %c0_i32_5 : i32 to vector<128x128xi32>
    %20 = arith.cmpi ne, %18, %19 : vector<128x128xi32>
    %c15_i32 = arith.constant 15 : i32
    %21 = vector.broadcast %c15_i32 : i32 to vector<128x128xi32>
    %22 = arith.cmpi ne, %18, %21 : vector<128x128xi32>
    %c1_i32_6 = arith.constant 1 : i32
    %23 = tpu.dynamic_rotate %1 by %c1_i32_6 dim 0 : vector<128x128xf32>, i32 -> vector<128x128xf32>
    %cst = arith.constant 0.000000e+00 : f32
    %24 = vector.broadcast %cst : f32 to vector<128x128xf32>
    %25 = arith.select %20, %23, %24 : vector<128x128xi1>, vector<128x128xf32>
    %c127_i32 = arith.constant 127 : i32
    %26 = tpu.dynamic_rotate %1 by %c127_i32 dim 0 : vector<128x128xf32>, i32 -> vector<128x128xf32>
    %cst_7 = arith.constant 0.000000e+00 : f32
    %27 = vector.broadcast %cst_7 : f32 to vector<128x128xf32>
    %28 = arith.select %22, %26, %27 : vector<128x128xi1>, vector<128x128xf32>
    %29 = tpu.concatenate %25, %1, %28 in 1 : vector<128x128xf32>, vector<128x128xf32>, vector<128x128xf32> -> vector<128x384xf32>
    %30 = arith.truncf %29 : vector<128x384xf32> to vector<128x384xbf16>
    %c0_8 = arith.constant 0 : index
    %c0_9 = arith.constant 0 : index
    %31 = vector.load %arg2[%c0_8, %c0_9] : memref<384x128xbf16, #tpu.memory_space<vmem>>, vector<384x128xbf16>
    %cst_10 = arith.constant dense<0.000000e+00> : vector<128x128xf32>
    %32 = tpu.matmul %30, %31, %cst_10 {dimension_numbers = #tpu.dot_dimension_numbers<[1], [0], [0], [1], [0, 0, 1, 1], [], []>} : vector<128x384xbf16>, vector<384x128xbf16>, vector<128x128xf32> -> vector<128x128xf32>
    %c0_11 = arith.constant 0 : index
    %c0_12 = arith.constant 0 : index
    %33 = vector.load %arg4[%c0_11, %c0_12] : memref<2x128xf32, #tpu.memory_space<vmem>>, vector<1x128xf32>
    %34 = vector.broadcast %33 : vector<1x128xf32> to vector<128x128xf32>
    %35 = arith.addf %32, %34 : vector<128x128xf32>
    %cst_13 = arith.constant 0.000000e+00 : f32
    %cst_14 = arith.constant 2.000000e+01 : f32
    %36 = vector.broadcast %cst_13 : f32 to vector<128x128xf32>
    %37 = arith.maximumf %36, %35 : vector<128x128xf32>
    %38 = vector.broadcast %cst_14 : f32 to vector<128x128xf32>
    %39 = arith.minimumf %38, %37 : vector<128x128xf32>
    %c1_i32_15 = arith.constant 1 : i32
    %40 = tpu.dynamic_rotate %39 by %c1_i32_15 dim 0 : vector<128x128xf32>, i32 -> vector<128x128xf32>
    %cst_16 = arith.constant 0.000000e+00 : f32
    %41 = vector.broadcast %cst_16 : f32 to vector<128x128xf32>
    %42 = arith.select %20, %40, %41 : vector<128x128xi1>, vector<128x128xf32>
    %c127_i32_17 = arith.constant 127 : i32
    %43 = tpu.dynamic_rotate %39 by %c127_i32_17 dim 0 : vector<128x128xf32>, i32 -> vector<128x128xf32>
    %cst_18 = arith.constant 0.000000e+00 : f32
    %44 = vector.broadcast %cst_18 : f32 to vector<128x128xf32>
    %45 = arith.select %22, %43, %44 : vector<128x128xi1>, vector<128x128xf32>
    %46 = tpu.concatenate %42, %39, %45 in 1 : vector<128x128xf32>, vector<128x128xf32>, vector<128x128xf32> -> vector<128x384xf32>
    %47 = arith.truncf %46 : vector<128x384xf32> to vector<128x384xbf16>
    %c0_19 = arith.constant 0 : index
    %c0_20 = arith.constant 0 : index
    %48 = vector.load %arg3[%c0_19, %c0_20] : memref<384x128xbf16, #tpu.memory_space<vmem>>, vector<384x128xbf16>
    %cst_21 = arith.constant dense<0.000000e+00> : vector<128x128xf32>
    %49 = tpu.matmul %47, %48, %cst_21 {dimension_numbers = #tpu.dot_dimension_numbers<[1], [0], [0], [1], [0, 0, 1, 1], [], []>} : vector<128x384xbf16>, vector<384x128xbf16>, vector<128x128xf32> -> vector<128x128xf32>
    %c1 = arith.constant 1 : index
    %c0_22 = arith.constant 0 : index
    %50 = vector.load %arg4[%c1, %c0_22] : memref<2x128xf32, #tpu.memory_space<vmem>>, vector<1x128xf32>
    %51 = vector.broadcast %50 : vector<1x128xf32> to vector<128x128xf32>
    %52 = arith.addf %49, %51 : vector<128x128xf32>
    %53 = arith.addf %52, %1 : vector<128x128xf32>
    %cst_23 = arith.constant 0.000000e+00 : f32
    %cst_24 = arith.constant 2.000000e+01 : f32
    %54 = vector.broadcast %cst_23 : f32 to vector<128x128xf32>
    %55 = arith.maximumf %54, %53 : vector<128x128xf32>
    %56 = vector.broadcast %cst_24 : f32 to vector<128x128xf32>
    %57 = arith.minimumf %56, %55 : vector<128x128xf32>
    %58 = vector.shape_cast %57 : vector<128x128xf32> to vector<8x16x128xf32>
    %c0_25 = arith.constant 0 : index
    %c0_26 = arith.constant 0 : index
    %c0_27 = arith.constant 0 : index
    %59 = vector.load %arg5[%c0_25, %c0_26, %c0_27] : memref<8x16x128xf32, #tpu.memory_space<vmem>>, vector<8x16x128xf32>
    tpu.vector_store %arg5[%c0_25, %c0_26, %c0_27], %58 {strides = array<i32>} : memref<8x16x128xf32, #tpu.memory_space<vmem>>, vector<8x16x128xf32>,
    return
  }
  func.func @transform_0(%arg0: i32) -> (i32, i32, i32) {
    %c0_i32 = arith.constant 0 : i32
    %c0_i32_0 = arith.constant 0 : i32
    %c0_i32_1 = arith.constant 0 : i32
    return %arg0, %c0_i32, %c0_i32_0 : i32, i32, i32
  }
  func.func @transform_1(%arg0: i32) -> (i32, i32) {
    %c0_i32 = arith.constant 0 : i32
    %c0_i32_0 = arith.constant 0 : i32
    %c0_i32_1 = arith.constant 0 : i32
    return %c0_i32, %c0_i32_0 : i32, i32
  }
  func.func @transform_2(%arg0: i32) -> (i32, i32) {
    %c0_i32 = arith.constant 0 : i32
    %c0_i32_0 = arith.constant 0 : i32
    %c0_i32_1 = arith.constant 0 : i32
    return %c0_i32, %c0_i32_0 : i32, i32
  }
  func.func @transform_3(%arg0: i32) -> (i32, i32) {
    %c0_i32 = arith.constant 0 : i32
    %c0_i32_0 = arith.constant 0 : i32
    %c0_i32_1 = arith.constant 0 : i32
    return %c0_i32, %c0_i32_0 : i32, i32
  }
  func.func @transform_4(%arg0: i32) -> (i32, i32, i32) {
    %c0_i32 = arith.constant 0 : i32
    %c0_i32_0 = arith.constant 0 : i32
    %c0_i32_1 = arith.constant 0 : i32
    return %arg0, %c0_i32, %c0_i32_0 : i32, i32, i32
  }
}

</mosaic_0001>

<bundles_post_ra>
// kernel: tile.13
= control target key start
LH: loop header
LB: loop body
LE: loop exit
PB: predicated region body
PF: predicated region fallthrough
CT: control target
= control target key end

     0   :  { %s28_s0 = inlined_call_operand.vmem [shape: f32[8], index: 0, kind: input, shape index: {}]   ;;  %s29_s1 = inlined_call_operand.vmem [shape: f32[16,8], index: 1, kind: output, shape index: {}]  }
   0x1   :  { %v4_v0 = vld [vmem:[%s28_s0] ss:$0 sm:$0xff] }
   0x2   :  { %5 = vst [vmem:[%s29_s1] sm:$0xff] %v4_v0  ;;  %8 = vst [vmem:[%s29_s1 + $0x8] sm:$0xff] %v4_v0 }

// kernel: tile.18
= control target key start
LH: loop header
LB: loop body
LE: loop exit
PB: predicated region body
PF: predicated region fallthrough
CT: control target
= control target key end

     0   :  { %s133_s10 = smov 120   ;;  %s134_s11 = smov 104   ;;  %vm3_vm0 = vcmask 64512   ;;  %vm9_vm1 = vcmask 1048512   ;;  %vm15_vm2 = vcmask 982912   ;;  %vm21_vm3 = vcmask 917312   ;;  %s209_s0 = inlined_call_operand.vmem [shape: f32[16,8], index: 0, kind: input, shape index: {}]   ;;  %s210_s1 = inlined_call_operand.vmem [shape: f32[1,128], index: 1, kind: output, shape index: {}]  }
   0x1   :  { %v103_v0 = vld [vmem:[%s209_s0 + $0xf] sm:$0x1]   ;;  %v105_v1 = vld [vmem:[%s209_s0 + $0xd] sm:$0x1]   ;;  %v104_v2 = vld [vmem:[%s209_s0 + $0xe] sm:$0x1]  }
   0x2   :  { %7 = vrot.lane.b32.xlu0 %v103_v0, %s133_s10  ;;  %19 = vrot.lane.b32.xlu1 %v105_v1, %s134_s11  ;;  %v106_v3 = vld [vmem:[%s209_s0 + $0xc] sm:$0x1]   ;;  %s135_s16 = smov 112   ;;  %s136_s17 = smov 96   ;;  %v107_v4 = vld [vmem:[%s209_s0 + $0xb] sm:$0x1]  }
   0x3   :  { %v108_v5 = vld [vmem:[%s209_s0 + $0xa] sm:$0x1]   ;;  %v2_v6 = vld [vmem:[%s209_s0] sm:$0x1]   ;;  %s137_s24 = smov 88   ;;  %s138_s25 = smov 80  }
   0x4   :  { %4 = vst.msk [vmem:[#allocation0] sm:$0x1] %vm3_vm0, %v2_v6   ;;  %v109_v7 = vld [vmem:[%s209_s0 + $0x9] sm:$0x1]   ;;  %v110_v8 = vld [vmem:[%s209_s0 + $0x8] sm:$0x1]  }
   0x5   :  { %s139_s30 = smov 72   ;;  %s140_s2 = smov 64   ;;  %v111_v9 = vld [vmem:[%s209_s0 + $0x7] sm:$0x1]   ;;  %v112_v10 = vld [vmem:[%s209_s0 + $0x6] sm:$0x1]  }
   0x6   :  { %13 = vrot.lane.b32.xlu0 %v104_v2, %s135_s16  ;;  %25 = vrot.lane.b32.xlu1 %v106_v3, %s136_s17  ;;  %s141_s7 = smov 56   ;;  %s142_s8 = smov 48   ;;  %v113_v11 = vld [vmem:[%s209_s0 + $0x5] sm:$0x1]   ;;  %v114_v12 = vld [vmem:[%s209_s0 + $0x4] sm:$0x1]  }
   0x7   :  { %s143_s13 = smov 40   ;;  %s144_s14 = smov 32   ;;  %v115_v13 = vld [vmem:[%s209_s0 + $0x3] sm:$0x1]   ;;  %v116_v14 = vld [vmem:[%s209_s0 + $0x2] sm:$0x1]  }
   0x8   :  { %s145_s19 = smov 24   ;;  %s146_s20 = smov 16   ;;  %v117_v15 = vld [vmem:[%s209_s0 + $0x1] sm:$0x1]   ;;  %vm27_vm4 = vcmask 851712   ;;  %vm33_vm5 = vcmask 786112  }
   0x9   :  { %s147_s0 = smov 8   ;;  %vm39_vm6 = vcmask 720512   ;;  %vm45_vm7 = vcmask 654912   ;;  %vm51_vm8 = vcmask 589312   ;;  %vm57_vm9 = vcmask 523712  }
   0xa   :  { %31 = vrot.lane.b32.xlu0 %v107_v4, %s137_s24  ;;  %37 = vrot.lane.b32.xlu1 %v108_v5, %s138_s25  ;;  %vm63_vm10 = vcmask 458112   ;;  %vm69_vm11 = vcmask 392512   ;;  %vm75_vm12 = vcmask 326912   ;;  %vm81_vm13 = vcmask 261312  }
   0xb   :  { %vm87_vm14 = vcmask 195712   ;;  %vm93_vm15 = vcmask 130112  }
   0xe   :  { %43 = vrot.lane.b32.xlu0 %v109_v7, %s139_s30  ;;  %49 = vrot.lane.b32.xlu1 %v110_v8, %s140_s2 }
  0x12   :  { %55 = vrot.lane.b32.xlu0 %v111_v9, %s141_s7  ;;  %61 = vrot.lane.b32.xlu1 %v112_v10, %s142_s8 }
  0x16   :  { %67 = vrot.lane.b32.xlu0 %v113_v11, %s143_s13  ;;  %73 = vrot.lane.b32.xlu1 %v114_v12, %s144_s14 }
  0x1a   :  { %79 = vrot.lane.b32.xlu0 %v115_v13, %s145_s19  ;;  %85 = vrot.lane.b32.xlu1 %v116_v14, %s146_s20 }
  0x1e   :  { %91 = vrot.lane.b32.xlu0 %v117_v15, %s147_s0 }
  0x74   :  { %v8_v16 = vpop.permute.xlu0 %7   ;;  %v20_v17 = vpop.permute.xlu1 %19  }
  0x75   :  { %10 = vst.msk [vmem:[#allocation0] sm:$0x1] %vm9_vm1, %v8_v16  }
  0x78   :  { %v14_v18 = vpop.permute.xlu0 %13   ;;  %v26_v19 = vpop.permute.xlu1 %25  }
  0x79   :  { %16 = vst.msk [vmem:[#allocation0] sm:$0x1] %vm15_vm2, %v14_v18  }
  0x7a   :  { %22 = vst.msk [vmem:[#allocation0] sm:$0x1] %vm21_vm3, %v20_v17  }
  0x7b   :  { %28 = vst.msk [vmem:[#allocation0] sm:$0x1] %vm27_vm4, %v26_v19  }
  0x7c   :  { %v32_v20 = vpop.permute.xlu0 %31   ;;  %v38_v21 = vpop.permute.xlu1 %37  }
  0x7d   :  { %34 = vst.msk [vmem:[#allocation0] sm:$0x1] %vm33_vm5, %v32_v20  }
  0x7e   :  { %40 = vst.msk [vmem:[#allocation0] sm:$0x1] %vm39_vm6, %v38_v21  }
  0x80   :  { %v44_v22 = vpop.permute.xlu0 %43   ;;  %v50_v23 = vpop.permute.xlu1 %49  }
  0x81   :  { %46 = vst.msk [vmem:[#allocation0] sm:$0x1] %vm45_vm7, %v44_v22  }
  0x82   :  { %52 = vst.msk [vmem:[#allocation0] sm:$0x1] %vm51_vm8, %v50_v23  }
  0x84   :  { %v56_v24 = vpop.permute.xlu0 %55   ;;  %v62_v25 = vpop.permute.xlu1 %61  }
  0x85   :  { %58 = vst.msk [vmem:[#allocation0] sm:$0x1] %vm57_vm9, %v56_v24  }
  0x86   :  { %64 = vst.msk [vmem:[#allocation0] sm:$0x1] %vm63_vm10, %v62_v25  }
  0x88   :  { %v68_v26 = vpop.permute.xlu0 %67   ;;  %v74_v27 = vpop.permute.xlu1 %73  }
  0x89   :  { %70 = vst.msk [vmem:[#allocation0] sm:$0x1] %vm69_vm11, %v68_v26  }
  0x8a   :  { %76 = vst.msk [vmem:[#allocation0] sm:$0x1] %vm75_vm12, %v74_v27  }
  0x8c   :  { %v80_v28 = vpop.permute.xlu0 %79   ;;  %v86_v29 = vpop.permute.xlu1 %85  }
  0x8d   :  { %82 = vst.msk [vmem:[#allocation0] sm:$0x1] %vm81_vm13, %v80_v28  }
  0x8e   :  { %88 = vst.msk [vmem:[#allocation0] sm:$0x1] %vm87_vm14, %v86_v29  }
  0x90   :  { %v92_v30 = vpop.permute.xlu0 %91  }
  0x91   :  { %94 = vst.msk [vmem:[#allocation0] sm:$0x1] %vm93_vm15, %v92_v30  }
  0x98   :  { %v99_v31 = vld [vmem:[#allocation0] sm:$0x1] }
  0x99   :  { %102 = vst [vmem:[%s210_s1] sm:$0x1] %v99_v31 }

// kernel: basic_block_forward.1
= control target key start
LH: loop header
LB: loop body
LE: loop exit
PB: predicated region body
PF: predicated region fallthrough
CT: control target
= control target key end

     0   :  { %v34_v11 = vlaneseq  ;;  %vm1834_vm4 = vmmov 1   ;;  %s2681_s1 = inlined_call_operand.vmem [shape: bf16[384,128], index: 1, kind: input, shape index: {}]   ;;  %s2682_s0 = inlined_call_operand.vmem [shape: f32[8,16,128], index: 0, kind: input, shape index: {}, may-alias: {0,4}]   ;;  %s2683_s2 = inlined_call_operand.vmem [shape: bf16[384,128], index: 2, kind: input, shape index: {}]   ;;  %s2684_s3 = inlined_call_operand.vmem [shape: f32[2,128], index: 3, kind: input, shape index: {}]   ;;  %s2685_s4 = inlined_call_operand.vmem [shape: f32[8,16,128], index: 4, kind: output, shape index: {}, may-alias: {0,4}]  }
   0x1   :  { %v1770_v0 = vld [vmem:[%s2681_s1 + $0x78] sm:$0xff]   ;;  %v1772_v2 = vld [vmem:[%s2681_s1 + $0x70] sm:$0xff]   ;;  %v1775_v5 = vld [vmem:[%s2681_s1 + $0x68] sm:$0xff]  }
   0x2   :  { %v1771_v1 = vld [vmem:[%s2681_s1 + $0x38] sm:$0xff]   ;;  %1545 = vmatprep.subr.bf16.mxu0 %v1770_v0  ;;  %v1774_v4 = vld [vmem:[%s2681_s1 + $0x30] sm:$0xff]   ;;  %v1777_v7 = vld [vmem:[%s2681_s1 + $0x28] sm:$0xff]   ;;  %v1902_v15 = vshrl.u32 %v34_v11, 7 }
   0x3   :  { %1546 = vmatpush3.bf16.msra.mxu0 %v1771_v1  ;;  %v1773_v3 = vld [vmem:[%s2681_s1 + $0xb8] sm:$0xff]   ;;  %v1776_v6 = vld [vmem:[%s2681_s1 + $0xb0] sm:$0xff]   ;;  %v1778_v8 = vld [vmem:[%s2681_s1 + $0x60] sm:$0xff]  }
   0x4   :  { %1547 = vmatprep.subr.bf16.mxu0 %v1772_v2  ;;  %1705 = vmatprep.subr.bf16.mxu1 %v1773_v3  ;;  %v1779_v9 = vld [vmem:[%s2681_s1 + $0xa8] sm:$0xff]   ;;  %v1780_v10 = vld [vmem:[%s2681_s1 + $0x20] sm:$0xff]   ;;  %v1781_v12 = vld [vmem:[%s2681_s1 + $0x58] sm:$0xff]   ;;  %v36_v19 = vadd.s32 8, %v1902_v15  ;;  %v55_v22 = vand.u32 15, %v1902_v15  ;;  %v38_v24 = vadd.s32 24, %v1902_v15 }
   0x5   :  { %1706 = vmatpush3.bf16.msra.mxu1 %v1773_v3  ;;  %v1782_v13 = vld [vmem:[%s2681_s1 + $0xa0] sm:$0xff]   ;;  %v1783_v14 = vld [vmem:[%s2681_s1 + $0x18] sm:$0xff]   ;;  %v1784_v17 = vld [vmem:[%s2681_s1 + $0x50] sm:$0xff]   ;;  %vm291_vm0 = vcmp.lt.s32.totalorder %v1902_v15, 1  ;;  %vm2686_vm1 = vcmp.lt.s32.totalorder %v1902_v15, 7  ;;  %v40_v30 = vadd.s32 40, %v1902_v15 }
   0x6   :  { %1707 = vmatprep.subr.bf16.mxu1 %v1776_v6  ;;  %v1785_v16 = vld [vmem:[%s2681_s1 + $0x98] sm:$0xff]   ;;  %v1786_v18 = vld [vmem:[%s2681_s1 + $0x10] sm:$0xff]   ;;  %v1787_v21 = vld [vmem:[%s2681_s1 + $0x48] sm:$0xff]   ;;  %v62_v26 = vand.u32 15, %v36_v19  ;;  %v76_v39 = vand.u32 15, %v38_v24  ;;  %vm1959_vm2 = vcmp.ne.s32.totalorder %v55_v22, 0 }
   0x7   :  { %1548 = vmatpush3.bf16.msra.mxu0 %v1774_v4  ;;  %v1788_v20 = vld [vmem:[%s2681_s1 + $0x90] sm:$0xff]   ;;  %v1789_v23 = vld [vmem:[%s2681_s1 + $0x8] sm:$0xff]   ;;  %v1931_v27 = vld [vmem:[%s2682_s0] sm:$0xff]  ;;  %v37_v53 = vadd.s32 16, %v1902_v15  ;;  %v90_v55 = vand.u32 15, %v40_v30  ;;  %v42_v56 = vadd.s32 56, %v1902_v15 }
   0x8   :  { %1549 = vmatprep.subr.bf16.mxu0 %v1775_v5  ;;  %v1791_v25 = vld [vmem:[%s2681_s1 + $0x88] sm:$0xff]   ;;  %v1941_v29 = vld [vmem:[%s2682_s0 + $0x78] sm:$0xff]  ;;  %v1790_v31 = vld [vmem:[%s2681_s1 + $0x40] sm:$0xff]   ;;  %v275_v32 = vrot.slane %v1931_v27, 7  ;;  %v324_v37 = vrot.slane %v1931_v27, 1  ;;  %vm1967_vm3 = vcmp.ne.s32.totalorder %v62_v26, 15 }
   0x9   :  { %1708 = vmatpush3.bf16.msra.mxu1 %v1776_v6  ;;  %v1936_v28 = vld [vmem:[%s2682_s0 + $0x8] sm:$0xff]  ;;  %v290_v35 = vrot.slane %v1941_v29, 7  ;;  %v20_v36 = vld [vmem:[%s2682_s0 + $0x10] sm:$0xff]  ;;  %v1974_v44 = vld [vmem:[%s2682_s0 + $0x18] sm:$0xff]  ;;  %vm2013_vm6 = vcmp.ne.s32.totalorder %v76_v39, 15  ;;  %vm264_vm8 = vcmp.ne.s32.totalorder %v90_v55, 15 }
   0xa   :  { %1709 = vmatprep.subr.bf16.mxu1 %v1779_v9  ;;  %v276_v33 = vrot.slane %v1936_v28, 7  ;;  %v374_v34 = vpack.c.bf16 %v1936_v28, %v1931_v27  ;;  %v325_v38 = vrot.slane %v1936_v28, 1  ;;  %v326_v43 = vrot.slane %v20_v36, 1  ;;  %v1979_v45 = vld [vmem:[%s2682_s0 + $0x20] sm:$0xff]  ;;  %v2003_v54 = vld [vmem:[%s2682_s0 + $0x30] sm:$0xff]  ;;  %vm2009_vm5 = vmpackc.low %vm1967_vm3, %vm1834_vm4 }
   0xb   :  { %1550 = vmatpush3.bf16.msra.mxu0 %v1777_v7  ;;  %v1792_v46 = vld [vmem:[%s2681_s1] sm:$0xff]   ;;  %v307_v47 = vsel %vm291_vm0, %v290_v35, %v275_v32  ;;  %v327_v50 = vrot.slane %v1974_v44, 1  ;;  %v328_v51 = vrot.slane %v1979_v45, 1  ;;  %v277_v63 = vrot.slane %v20_v36, 7  ;;  %v2024_v0 = vld [vmem:[%s2682_s0 + $0x28] sm:$0xff]  ;;  %vm2029_vm7 = vmpackc.low %vm1834_vm4, %vm1959_vm2 }
   0xc   :  { %1551 = vmatprep.subr.bf16.mxu0 %v1778_v8  ;;  %626 = vmatprep.mubr.bf16.mxu0 %v374_v34  ;;  %v306_v41 = vsel %vm291_vm0, %v275_v32, %v276_v33  ;;  %v1793_v48 = vld [vmem:[%s2681_s1 + $0x80] sm:$0xff]   ;;  %v355_v49 = vsel %vm2686_vm1, %v324_v37, %v325_v38  ;;  %v354_v52 = vsel %vm2686_vm1, %v325_v38, %v326_v43  ;;  %v278_v3 = vrot.slane %v1974_v44, 7  ;;  %v2040_v6 = vld [vmem:[%s2682_s0 + $0x38] sm:$0xff]  ;;  %vm2058_vm9 = vmpackc.low %vm2013_vm6, %vm1834_vm4 }
   0xd   :  { %1710 = vmatpush3.bf16.msra.mxu1 %v1779_v9  ;;  %v1449_v58 = vpack.c.bf16 %v354_v52, %v355_v49  ;;  %v1425_v60 = vpack.c.bf16 %v306_v41, %v307_v47  ;;  %v352_v61 = vsel %vm2686_vm1, %v327_v50, %v328_v51  ;;  %v353_v62 = vsel %vm2686_vm1, %v326_v43, %v327_v50  ;;  %v2045_v7 = vld [vmem:[%s2682_s0 + $0x40] sm:$0xff]  ;;  %vm2071_vm10 = vmpackc.low %vm264_vm8, %vm1834_vm4  ;;  %v2088_v24 = vld [vmem:[%s2682_s0 + $0x48] sm:$0xff] }
   0xe   :  { %1711 = vmatprep.subr.bf16.mxu1 %v1782_v13  ;;  %v377_v2 = vpack.c.bf16 %v1974_v44, %v20_v36  ;;  %v329_v4 = vrot.slane %v2024_v0, 1  ;;  %v330_v5 = vrot.slane %v2003_v54, 1  ;;  %v69_v8 = vand.u32 15, %v37_v53  ;;  %v2115_v41 = vld [vmem:[%s2682_s0 + $0x58] sm:$0xff]  ;;  %v2120_v42 = vld [vmem:[%s2682_s0 + $0x60] sm:$0xff] }
   0xf   :  { %1552 = vmatpush3.bf16.msra.mxu0 %v1780_v10  ;;  %1721 = vmatprep.mubr.msk.bf16.mxu1 %vm2009_vm5, %v1449_v58  ;;  %v104_v9 = vand.u32 15, %v42_v56  ;;  %v1452_v10 = vpack.c.bf16 %v352_v61, %v353_v62  ;;  %v305_v19 = vsel %vm291_vm0, %v276_v33, %v277_v63  ;;  %v39_v22 = vadd.s32 32, %v1902_v15  ;;  %v2148_v56 = vld [vmem:[%s2682_s0 + $0x70] sm:$0xff]  ;;  %v2159_v62 = vld [vmem:[%s2682_s0 + $0x68] sm:$0xff] }
  0x10   :  { %1553 = vmatprep.subr.bf16.mxu0 %v1781_v12  ;;  %v350_v11 = vsel %vm2686_vm1, %v329_v4, %v330_v5  ;;  %v351_v12 = vsel %vm2686_vm1, %v328_v51, %v329_v4  ;;  %vm245_vm11 = vcmp.ne.s32.totalorder %v69_v8, 0  ;;  %v280_v26 = vrot.slane %v2024_v0, 7 }
  0x11   :  { %1712 = vmatpush3.bf16.msra.mxu1 %v1782_v13  ;;  %vm2081_vm12 = vcmp.ne.s32.totalorder %v104_v9, 15  ;;  %v44_v28 = vadd.s32 72, %v1902_v15  ;;  %v333_v30 = vrot.slane %v2088_v24, 1  ;;  %vm2104_vm13 = vmpackc.low %vm1834_vm4, %vm245_vm11  ;;  %v380_v38 = vpack.c.bf16 %v2024_v0, %v1979_v45 }
  0x12   :  { %1713 = vmatprep.subr.bf16.mxu1 %v1785_v16  ;;  %v46_v43 = vadd.s32 88, %v1902_v15  ;;  %v83_v44 = vand.u32 15, %v39_v22  ;;  %vm2134_vm15 = vmpackc.low %vm2081_vm12, %vm1834_vm4  ;;  %v335_v51 = vrot.slane %v2115_v41, 1  ;;  %v336_v52 = vrot.slane %v2120_v42, 1 }
  0x13   :  { %1554 = vmatpush3.bf16.msra.mxu0 %v1783_v14  ;;  %v1455_v14 = vpack.c.bf16 %v350_v11, %v351_v12  ;;  %v118_v39 = vand.u32 15, %v44_v28  ;;  %v41_v58 = vadd.s32 48, %v1902_v15  ;;  %v281_v61 = vrot.slane %v2003_v54, 7 }
  0x14   :  { %1555 = vmatprep.subr.bf16.mxu0 %v1784_v17  ;;  %v332_v17 = vrot.slane %v2045_v7, 1  ;;  %v132_v55 = vand.u32 15, %v46_v43  ;;  %vm247_vm3 = vcmp.ne.s32.totalorder %v83_v44, 0  ;;  %v344_v0 = vsel %vm2686_vm1, %v335_v51, %v336_v52 }
  0x15   :  { %1714 = vmatpush3.bf16.msra.mxu1 %v1785_v16  ;;  %v331_v16 = vrot.slane %v2040_v6, 1  ;;  %vm268_vm14 = vcmp.ne.s32.totalorder %v118_v39, 15  ;;  %vm2171_vm6 = vmpackc.low %vm1834_vm4, %vm247_vm3  ;;  %v50_v9 = vadd.s32 120, %v1902_v15  ;;  %v2722_v43 = vmov 0 }
  0x16   :  { %1715 = vmatprep.subr.bf16.mxu1 %v1788_v20  ;;  %v347_v40 = vsel %vm2686_vm1, %v332_v17, %v333_v30  ;;  %vm2141_vm2 = vmpackc.low %vm268_vm14, %vm1834_vm4  ;;  %vm270_vm8 = vcmp.ne.s32.totalorder %v132_v55, 15  ;;  %v287_v55 = vrot.slane %v2120_v42, 7 }
  0x17   :  { %1556 = vmatpush3.bf16.msra.mxu0 %v1786_v18  ;;  %v304_v18 = vsel %vm291_vm0, %v277_v63, %v278_v3  ;;  %v348_v32 = vsel %vm2686_vm1, %v331_v16, %v332_v17  ;;  %v349_v33 = vsel %vm2686_vm1, %v330_v5, %v331_v16  ;;  %v48_v63 = vadd.s32 104, %v1902_v15  ;;  %vm2184_vm12 = vmpackc.low %vm270_vm8, %vm1834_vm4 }
  0x18   :  { %1557 = vmatprep.subr.bf16.mxu0 %v1787_v21  ;;  %v2078_v21 = vld [vmem:[%s2682_s0 + $0x50] sm:$0xff]  ;;  %v1458_v47 = vpack.c.bf16 %v348_v32, %v349_v33  ;;  %v282_v5 = vrot.slane %v2040_v6, 7  ;;  %v339_v17 = vrot.slane %v1941_v29, 1  ;;  %v386_v32 = vpack.c.bf16 %v2088_v24, %v2045_v7 }
  0x19   :  { %1716 = vmatpush3.bf16.msra.mxu1 %v1788_v20  ;;  %v334_v34 = vrot.slane %v2078_v21, 1  ;;  %v146_v8 = vand.u32 15, %v48_v63  ;;  %v283_v33 = vrot.slane %v2045_v7, 7  ;;  %v389_v44 = vpack.c.bf16 %v2115_v41, %v2078_v21 }
  0x1a   :  { %1717 = vmatprep.subr.bf16.mxu1 %v1791_v25  ;;  %v49_v63 = vadd.s32 112, %v1902_v15 }
  0x1b   :  { %1558 = vmatpush3.bf16.msra.mxu0 %v1789_v23  ;;  %vm272_vm11 = vcmp.ne.s32.totalorder %v146_v8, 15  ;;  %v160_v23 = vand.u32 15, %v50_v9  ;;  %v299_v7 = vsel %vm291_vm0, %v282_v5, %v283_v33  ;;  %v1818_v9 = vld [vmem:[%s2682_s0] sm:$0xff] }
  0x1c   :  { %1559 = vmatprep.subr.bf16.mxu0 %v1790_v31  ;;  %v1428_v31 = vpack.c.bf16 %v304_v18, %v305_v19  ;;  %v300_v18 = vsel %vm291_vm0, %v281_v61, %v282_v5  ;;  %v301_v19 = vsel %vm291_vm0, %v280_v26, %v281_v61  ;;  %vm2194_vm14 = vmpackc.low %vm272_vm11, %vm1834_vm4 }
  0x1d   :  { %1718 = vmatpush3.bf16.msra.mxu1 %v1791_v25  ;;  %v279_v25 = vrot.slane %v1979_v45, 7  ;;  %v346_v45 = vsel %vm2686_vm1, %v333_v30, %v334_v34  ;;  %v1434_v28 = vpack.c.bf16 %v300_v18, %v301_v19  ;;  %vm274_vm11 = vcmp.ne.s32.totalorder %v160_v23, 15  ;;  %v1803_v18 = vld [vmem:[%s2683_s2 + $0x38] sm:$0xff]   ;;  %v1804_v19 = vld [vmem:[%s2683_s2 + $0x70] sm:$0xff]  }
  0x1e   :  { %1719 = vmatprep.subr.bf16.mxu1 %v1793_v48  ;;  %v1461_v50 = vpack.c.bf16 %v346_v45, %v347_v40  ;;  %v285_v45 = vrot.slane %v2078_v21, 7  ;;  %v2724_v21 = vmov 0  ;;  %v1805_v23 = vld [vmem:[%s2683_s2 + $0x30] sm:$0xff]  }
  0x1f   :  { %1560 = vmatpush3.bf16.msra.mxu0 %v1792_v46  ;;  %v302_v46 = vsel %vm291_vm0, %v279_v25, %v280_v26  ;;  %v356_v26 = vsel %vm2686_vm1, %v339_v17, %v324_v37 }
  0x21   :  { %1720 = vmatpush3.bf16.msra.mxu1 %v1793_v48  ;;  %v303_v48 = vsel %vm291_vm0, %v278_v3, %v279_v25  ;;  %v337_v3 = vrot.slane %v2159_v62, 1  ;;  %v43_v25 = vadd.s32 64, %v1902_v15 }
  0x22   :  { %1426 = vmatmul.mubr.msk.bf16.vlgmr.msra.gmra.mxu0 %vm2029_vm7, %v1425_v60  ;;  %v1431_v59 = vpack.c.bf16 %v302_v46, %v303_v48  ;;  %v383_v60 = vpack.c.bf16 %v2040_v6, %v2003_v54  ;;  %v338_v54 = vrot.slane %v2148_v56, 1  ;;  %v286_v46 = vrot.slane %v2115_v41, 7 }
  0x23   :  { %634 = vmatprep.mubr.bf16.mxu0 %v377_v2  ;;  %v345_v2 = vsel %vm2686_vm1, %v334_v34, %v335_v51  ;;  %v343_v12 = vsel %vm2686_vm1, %v336_v52, %v337_v3  ;;  %v284_v34 = vrot.slane %v2088_v24, 7  ;;  %v45_v24 = vadd.s32 80, %v1902_v15 }
  0x24   :  { %1722 = vmatmul.mubr.msk.bf16.vlgmr.msra.gmra.mxu1 %vm2058_vm9, %v1452_v10  ;;  %v97_v10 = vand.u32 15, %v41_v58  ;;  %v342_v11 = vsel %vm2686_vm1, %v337_v3, %v338_v54  ;;  %v341_v30 = vsel %vm2686_vm1, %v338_v54, %v339_v17  ;;  %vm2221_vm1 = vmpackc.low %vm274_vm11, %vm1834_vm4  ;;  %v296_v48 = vsel %vm291_vm0, %v285_v45, %v286_v46  ;;  %v1802_v17 = vld [vmem:[%s2683_s2 + $0x78] sm:$0xff]  }
  0x25   :  { %1725 = vmatprep.mubr.msk.bf16.mxu1 %vm2071_vm10, %v1455_v14  ;;  %v1464_v14 = vpack.c.bf16 %v344_v0, %v345_v2  ;;  %v1467_v6 = vpack.c.bf16 %v342_v11, %v343_v12  ;;  %v1470_v39 = vpack.c.bf16 %v356_v26, %v341_v30  ;;  %v298_v37 = vsel %vm291_vm0, %v283_v33, %v284_v34  ;;  %v1798_v11 = vld [vmem:[%s2683_s2 + $0x98] sm:$0xff]   ;;  %v1799_v12 = vld [vmem:[%s2683_s2 + $0x90] sm:$0xff]   ;;  %v1808_v30 = vld [vmem:[%s2683_s2 + $0x60] sm:$0xff]  }
  0x26   :  { %vm249_vm3 = vcmp.ne.s32.totalorder %v97_v10, 0  ;;  %v1437_v40 = vpack.c.bf16 %v298_v37, %v299_v7  ;;  %v47_v51 = vadd.s32 96, %v1902_v15  ;;  %v392_v41 = vpack.c.bf16 %v2159_v62, %v2120_v42  ;;  %v1797_v10 = vld [vmem:[%s2683_s2 + $0xa0] sm:$0xff]   ;;  %1625 = vmatprep.subr.bf16.mxu1 %v1802_v17  ;;  %v1811_v33 = vld [vmem:[%s2683_s2 + $0x18] sm:$0xff]   ;;  %v1815_v37 = vld [vmem:[%s2683_s2 + $0x8] sm:$0xff]  }
  0x27   :  { %vm2210_vm8 = vmpackc.low %vm1834_vm4, %vm249_vm3  ;;  %v288_v58 = vrot.slane %v2159_v62, 7  ;;  %v295_v61 = vsel %vm291_vm0, %v286_v46, %v287_v55  ;;  %v395_v62 = vpack.c.bf16 %v1941_v29, %v2148_v56  ;;  %v289_v2 = vrot.slane %v2148_v56, 7  ;;  %v1794_v29 = vld [vmem:[%s2683_s2 + $0xb8] sm:$0xff]   ;;  %v1796_v56 = vld [vmem:[%s2683_s2 + $0xa8] sm:$0xff]   ;;  %1626 = vmatpush3.bf16.msra.mxu1 %v1803_v18 }
  0x28   :  { %v153_v3 = vand.u32 15, %v49_v63  ;;  %1737 = vmatprep.subr.bf16.mxu0 %v1794_v29  ;;  %1627 = vmatprep.subr.bf16.mxu1 %v1804_v19  ;;  %v1809_v26 = vld [vmem:[%s2683_s2 + $0x20] sm:$0xff]  }
  0x29   :  { %v292_v54 = vsel %vm291_vm0, %v289_v2, %v290_v35  ;;  %v293_v5 = vsel %vm291_vm0, %v288_v58, %v289_v2  ;;  %1738 = vmatpush3.bf16.msra.mxu0 %v1794_v29  ;;  %v1795_v35 = vld [vmem:[%s2683_s2 + $0xb0] sm:$0xff]   ;;  %v1816_v7 = vld [vmem:[%s2683_s2 + $0x40] sm:$0xff]  }
  0x2a   :  { %1429 = vmatmul.mubr.msk.bf16.gmra.mxu0 %vm2104_vm13, %v1428_v31  ;;  %v2718_v31 = vmov 0  ;;  %v1446_v8 = vpack.c.bf16 %v292_v54, %v293_v5  ;;  %1739 = vmatprep.subr.bf16.mxu0 %v1795_v35  ;;  %v2567_v42 = vld [vmem:[%s2684_s3 + $0x1] ss:$0 sm:$0xff] }
  0x2b   :  { %642 = vmatprep.mubr.bf16.mxu0 %v380_v38  ;;  %v2719_v31 = vsel %vm2210_vm8, 4294967295, %v2718_v31  ;;  %v111_v38 = vand.u32 15, %v43_v25  ;;  %1628 = vmatpush3.bf16.msra.mxu1 %v1805_v23  ;;  %v1806_v25 = vld [vmem:[%s2683_s2 + $0x68] sm:$0xff]  }
  0x2c   :  { %1726 = vmatmul.mubr.msk.bf16.gmra.mxu1 %vm2134_vm15, %v1458_v47  ;;  %v125_v47 = vand.u32 15, %v45_v24  ;;  %1629 = vmatprep.subr.bf16.mxu1 %v1806_v25  ;;  %v1817_v24 = vld [vmem:[%s2683_s2] sm:$0xff]  }
  0x2d   :  { %1729 = vmatprep.mubr.msk.bf16.mxu1 %vm2141_vm2, %v1461_v50  ;;  %vm251_vm3 = vcmp.ne.s32.totalorder %v111_v38, 0  ;;  %v297_v50 = vsel %vm291_vm0, %v284_v34, %v285_v45  ;;  %1740 = vmatpush3.bf16.msra.mxu0 %v1795_v35  ;;  %v1812_v34 = vld [vmem:[%s2683_s2 + $0x50] sm:$0xff]   ;;  %v2362_v45 = vld [vmem:[%s2684_s3] ss:$0 sm:$0xff] }
  0x2e   :  { %vm253_vm11 = vcmp.ne.s32.totalorder %v125_v47, 0  ;;  %v1440_v52 = vpack.c.bf16 %v296_v48, %v297_v50  ;;  %1741 = vmatprep.subr.bf16.mxu0 %v1796_v56  ;;  %v1813_v38 = vld [vmem:[%s2683_s2 + $0x10] sm:$0xff]  }
  0x31   :  { %1742 = vmatpush3.bf16.msra.mxu0 %v1796_v56 }
  0x32   :  { %1432 = vmatmul.mubr.msk.bf16.gmra.mxu0 %vm2171_vm6, %v1431_v59  ;;  %v139_v59 = vand.u32 15, %v47_v51  ;;  %1743 = vmatprep.subr.bf16.mxu0 %v1797_v10 }
  0x33   :  { %650 = vmatprep.mubr.bf16.mxu0 %v383_v60  ;;  %v294_v60 = vsel %vm291_vm0, %v287_v55, %v288_v58 }
  0x34   :  { %1730 = vmatmul.mubr.msk.bf16.gmra.mxu1 %vm2184_vm12, %v1464_v14  ;;  %v1443_v0 = vpack.c.bf16 %v294_v60, %v295_v61  ;;  %v1800_v14 = vld [vmem:[%s2683_s2 + $0x88] sm:$0xff]  }
  0x35   :  { %1733 = vmatprep.mubr.msk.bf16.mxu1 %vm2194_vm14, %v1467_v6  ;;  %1744 = vmatpush3.bf16.msra.mxu0 %v1797_v10  ;;  %v1801_v6 = vld [vmem:[%s2683_s2 + $0x80] sm:$0xff]  }
  0x36   :  { %1745 = vmatprep.subr.bf16.mxu0 %v1798_v11 }
  0x39   :  { %1746 = vmatpush3.bf16.msra.mxu0 %v1798_v11 }
  0x3a   :  { %1435 = vmatmul.mubr.msk.bf16.gmra.mxu0 %vm2210_vm8, %v1434_v28  ;;  %vm2233_vm8 = vmpackc.low %vm1834_vm4, %vm251_vm3  ;;  %1747 = vmatprep.subr.bf16.mxu0 %v1799_v12  ;;  %v1807_v28 = vld [vmem:[%s2683_s2 + $0x28] sm:$0xff]  }
  0x3b   :  { %658 = vmatprep.mubr.bf16.mxu0 %v386_v32  ;;  %v2723_v43 = vsel %vm2233_vm8, 4294967295, %v2722_v43  ;;  %vm2249_vm3 = vmpackc.low %vm1834_vm4, %vm253_vm11  ;;  %vm255_vm11 = vcmp.ne.s32.totalorder %v139_v59, 0  ;;  %1630 = vmatpush3.bf16.msra.mxu1 %v1807_v28  ;;  %v1810_v32 = vld [vmem:[%s2683_s2 + $0x58] sm:$0xff]  }
  0x3c   :  { %1734 = vmatmul.mubr.msk.bf16.gmra.mxu1 %vm2221_vm1, %v1470_v39  ;;  %v2725_v21 = vsel %vm2249_vm3, 4294967295, %v2724_v21  ;;  %1631 = vmatprep.subr.bf16.mxu1 %v1808_v30  ;;  %v1814_v39 = vld [vmem:[%s2683_s2 + $0x48] sm:$0xff]  }
  0x3d   :  { %1748 = vmatpush3.bf16.msra.mxu0 %v1799_v12 }
  0x3e   :  { %1749 = vmatprep.subr.bf16.mxu0 %v1800_v14 }
  0x3f   :  { %1632 = vmatpush3.bf16.msra.mxu1 %v1809_v26 }
  0x40   :  { %1633 = vmatprep.subr.bf16.mxu1 %v1810_v32 }
  0x41   :  { %1750 = vmatpush3.bf16.msra.mxu0 %v1800_v14 }
  0x42   :  { %1438 = vmatmul.mubr.msk.bf16.gmra.mxu0 %vm2233_vm8, %v1437_v40  ;;  %vm2265_vm8 = vmpackc.low %vm1834_vm4, %vm255_vm11  ;;  %vm257_vm11 = vcmp.ne.s32.totalorder %v153_v3, 0  ;;  %1751 = vmatprep.subr.bf16.mxu0 %v1801_v6 }
  0x43   :  { %666 = vmatprep.mubr.bf16.mxu0 %v389_v44  ;;  %1634 = vmatpush3.bf16.msra.mxu1 %v1811_v33 }
  0x44   :  { %1635 = vmatprep.subr.bf16.mxu1 %v1812_v34 }
  0x45   :  { %1752 = vmatpush3.bf16.msra.mxu0 %v1801_v6 }
  0x47   :  { %1636 = vmatpush3.bf16.msra.mxu1 %v1813_v38 }
  0x48   :  { %1637 = vmatprep.subr.bf16.mxu1 %v1814_v39 }
  0x4a   :  { %1441 = vmatmul.mubr.msk.bf16.gmra.mxu0 %vm2249_vm3, %v1440_v52  ;;  %vm2281_vm3 = vmpackc.low %vm1834_vm4, %vm257_vm11  ;;  %vm2730_vm4 = vcmp.lt.s32.totalorder %v1902_v15, 7 }
  0x4b   :  { %674 = vmatprep.mubr.bf16.mxu0 %v392_v41  ;;  %1638 = vmatpush3.bf16.msra.mxu1 %v1815_v37  ;;  %vm2731_vm11 = vmmov %vm2730_vm4 }
  0x4c   :  { %1639 = vmatprep.subr.bf16.mxu1 %v1816_v7 }
  0x4f   :  { %1640 = vmatpush3.bf16.msra.mxu1 %v1817_v24 }
  0x52   :  { %1444 = vmatmul.mubr.msk.bf16.gmra.mxu0 %vm2265_vm8, %v1443_v0 }
  0x53   :  { %682 = vmatprep.mubr.bf16.mxu0 %v395_v62 }
  0x5a   :  { %1447 = vmatmul.mubr.msk.bf16.gmra.mxu0 %vm2281_vm3, %v1446_v8 }
  0xe2   :  { %v1561_v40 = vpop.f32.mrf.mxu0 }
  0xe4   :  { %v1562_v44 = vpop.f32.mrf.mxu0  ;;  %v1723_v47 = vpop.f32.mrf.mxu1 }
  0xe5   :  { %v1563_v46 = vadd.f32 %v1562_v44, %v1561_v40 }
  0xe6   :  { %v1564_v48 = vpop.f32.mrf.mxu0  ;;  %v725_v51 = vpop.f32.mrf.mxu1 }
  0xe7   :  { %v629_v50 = vadd.f32 %v1563_v46, %v2362_v45 }
  0xe8   :  { %v1565_v52 = vpop.f32.mrf.mxu0  ;;  %v1724_v55 = vpop.f32.mrf.mxu1 }
  0xe9   :  { %v1566_v41 = vadd.f32 %v1565_v52, %v1564_v48  ;;  %v726_v58 = vadd.f32 %v725_v51, %v629_v50 }
  0xea   :  { %v1567_v59 = vpop.f32.mrf.mxu0  ;;  %v728_v61 = vpop.f32.mrf.mxu1 }
  0xeb   :  { %v632_v60 = vadd.f32 %v1566_v41, %v2362_v45  ;;  %v788_v2 = vmax.f32 %v726_v58, 0.0 }
  0xec   :  { %v1568_v63 = vpop.f32.mrf.mxu0  ;;  %v1727_v54 = vpop.f32.mrf.mxu1 }
  0xed   :  { %v1569_v0 = vadd.f32 %v1568_v63, %v1567_v59  ;;  %v729_v62 = vadd.f32 %v728_v61, %v632_v60  ;;  %v2369_v11 = vmin.f32 %v788_v2, 20.0 }
  0xee   :  { %v1570_v3 = vpop.f32.mrf.mxu0  ;;  %v741_v14 = vpop.f32.mrf.mxu1 }
  0xef   :  { %v637_v5 = vadd.f32 %v1569_v0, %v2362_v45  ;;  %v789_v8 = vmax.f32 %v729_v62, 0.0  ;;  %v868_v26 = vrot.slane %v2369_v11, 1 }
  0xf0   :  { %v1571_v29 = vpop.f32.mrf.mxu0  ;;  %v1728_v33 = vpop.f32.mrf.mxu1 }
  0xf1   :  { %v734_v35 = vadd.f32 %v1723_v47, %v637_v5  ;;  %v2367_v56 = vmin.f32 %v789_v8, 20.0  ;;  %v1572_v10 = vadd.f32 %v1571_v29, %v1570_v3 }
  0xf2   :  { %v1573_v12 = vpop.f32.mrf.mxu0  ;;  %v744_v48 = vpop.f32.mrf.mxu1 }
  0xf3   :  { %v790_v6 = vmax.f32 %v734_v35, 0.0  ;;  %v640_v17 = vadd.f32 %v1572_v10, %v2362_v45  ;;  %v869_v18 = vrot.slane %v2367_v56, 1  ;;  %v917_v23 = vpack.c.bf16 %v2367_v56, %v2369_v11 }
  0xf4   :  { %v1574_v19 = vpop.f32.mrf.mxu0  ;;  %v1731_v63 = vpop.f32.mrf.mxu1 }
  0xf5   :  { %v2375_v25 = vmin.f32 %v790_v6, 20.0  ;;  %v737_v28 = vadd.f32 %v1724_v55, %v640_v17  ;;  %v1575_v30 = vadd.f32 %v1574_v19, %v1573_v12  ;;  %1169 = vmatprep.mubr.bf16.mxu1 %v917_v23  ;;  %v898_v7 = vsel %vm2730_vm4, %v868_v26, %v869_v18 }
  0xf6   :  { %v1576_v32 = vpop.f32.mrf.mxu0 }
  0xf7   :  { %v870_v34 = vrot.slane %v2375_v25, 1  ;;  %v791_v38 = vmax.f32 %v737_v28, 0.0  ;;  %v645_v39 = vadd.f32 %v1575_v30, %v2362_v45 }
  0xf8   :  { %v1577_v37 = vpop.f32.mrf.mxu0 }
  0xf9   :  { %v2384_v24 = vmin.f32 %v791_v38, 20.0  ;;  %v1578_v40 = vadd.f32 %v1577_v37, %v1576_v32  ;;  %v742_v44 = vadd.f32 %v741_v14, %v645_v39  ;;  %v897_v46 = vsel %vm2731_vm11, %v869_v18, %v870_v34  ;;  %vm2732_vm11 = vmmov %vm2730_vm4  ;;  %v757_v14 = vpop.f32.mrf.mxu1 }
  0xfa   :  { %v1579_v47 = vpop.f32.mrf.mxu0  ;;  %v1522_v50 = vpack.c.bf16 %v897_v46, %v898_v7 }
  0xfb   :  { %v792_v51 = vmax.f32 %v742_v44, 0.0  ;;  %v648_v52 = vadd.f32 %v1578_v40, %v2362_v45  ;;  %v871_v41 = vrot.slane %v2384_v24, 1  ;;  %v1732_v32 = vpop.f32.mrf.mxu1  ;;  %v823_v22 = vrot.slane %v2384_v24, 7 }
  0xfc   :  { %v1580_v55 = vpop.f32.mrf.mxu0  ;;  %1753 = vmatprep.mubr.msk.bf16.mxu0 %vm2009_vm5, %v1522_v50  ;;  %vm2733_vm5 = vmmov %vm2730_vm4 }
  0xfd   :  { %v2392_v58 = vmin.f32 %v792_v51, 20.0  ;;  %v1581_v59 = vadd.f32 %v1580_v55, %v1579_v47  ;;  %v745_v60 = vadd.f32 %v744_v48, %v648_v52  ;;  %v896_v3 = vsel %vm2730_vm4, %v870_v34, %v871_v41  ;;  %v760_v47 = vpop.f32.mrf.mxu1 }
  0xfe   :  { %v1582_v61 = vpop.f32.mrf.mxu0 }
  0xff   :  { %v872_v0 = vrot.slane %v2392_v58, 1  ;;  %v653_v62 = vadd.f32 %v1581_v59, %v2362_v45  ;;  %v793_v2 = vmax.f32 %v745_v60, 0.0  ;;  %v824_v1 = vrot.slane %v2392_v58, 7 }
 0x100   :  { %v1583_v5 = vpop.f32.mrf.mxu0 }
 0x101   :  { %v895_v8 = vsel %vm2732_vm11, %v871_v41, %v872_v0  ;;  %v750_v57 = vadd.f32 %v1727_v54, %v653_v62  ;;  %v2400_v29 = vmin.f32 %v793_v2, 20.0  ;;  %v1584_v35 = vadd.f32 %v1583_v5, %v1582_v61  ;;  %vm2736_vm11 = vmmov %vm2730_vm4 }
 0x102   :  { %v1525_v10 = vpack.c.bf16 %v895_v8, %v896_v3  ;;  %v1585_v12 = vpop.f32.mrf.mxu0 }
 0x103   :  { %v794_v6 = vmax.f32 %v750_v57, 0.0  ;;  %v656_v17 = vadd.f32 %v1584_v35, %v2362_v45  ;;  %v873_v18 = vrot.slane %v2400_v29, 1 }
 0x104   :  { %v1586_v19 = vpop.f32.mrf.mxu0  ;;  %1754 = vmatmul.mubr.msk.bf16.vlgmr.msra.gmra.mxu0 %vm2058_vm9, %v1525_v10  ;;  %vm2734_vm9 = vmmov %vm2730_vm4 }
 0x105   :  { %v2406_v23 = vmin.f32 %v794_v6, 20.0  ;;  %v753_v28 = vadd.f32 %v1728_v33, %v656_v17  ;;  %v1587_v30 = vadd.f32 %v1586_v19, %v1585_v12  ;;  %v894_v7 = vsel %vm2733_vm5, %v872_v0, %v873_v18  ;;  %v1735_v0 = vpop.f32.mrf.mxu1  ;;  %vm2738_vm5 = vmmov %vm2730_vm4 }
 0x106   :  { %v1588_v54 = vpop.f32.mrf.mxu0 }
 0x107   :  { %v874_v34 = vrot.slane %v2406_v23, 1  ;;  %v795_v38 = vmax.f32 %v753_v28, 0.0  ;;  %v661_v39 = vadd.f32 %v1587_v30, %v2362_v45  ;;  %v773_v6 = vpop.f32.mrf.mxu1  ;;  %v826_v36 = vrot.slane %v2406_v23, 7 }
 0x108   :  { %v1589_v37 = vpop.f32.mrf.mxu0 }
 0x109   :  { %v2412_v40 = vmin.f32 %v795_v38, 20.0  ;;  %v1590_v44 = vadd.f32 %v1589_v37, %v1588_v54  ;;  %v758_v13 = vadd.f32 %v757_v14, %v661_v39  ;;  %v893_v46 = vsel %vm2734_vm9, %v873_v18, %v874_v34  ;;  %v1736_v38 = vpop.f32.mrf.mxu1 }
 0x10a   :  { %v1591_v33 = vpop.f32.mrf.mxu0  ;;  %v1528_v48 = vpack.c.bf16 %v893_v46, %v894_v7 }
 0x10b   :  { %v796_v50 = vmax.f32 %v758_v13, 0.0  ;;  %v664_v51 = vadd.f32 %v1590_v44, %v2362_v45  ;;  %v875_v52 = vrot.slane %v2412_v40, 1 }
 0x10c   :  { %v1592_v41 = vpop.f32.mrf.mxu0  ;;  %1757 = vmatprep.mubr.msk.bf16.mxu0 %vm2071_vm10, %v1528_v48  ;;  %vm2735_vm10 = vmmov %vm2730_vm4  ;;  %v776_v48 = vpop.f32.mrf.mxu1 }
 0x10d   :  { %v2420_v55 = vmin.f32 %v796_v50, 20.0  ;;  %v1593_v59 = vadd.f32 %v1592_v41, %v1591_v33  ;;  %v761_v60 = vadd.f32 %v760_v47, %v664_v51  ;;  %v892_v8 = vsel %vm2730_vm4, %v874_v34, %v875_v52 }
 0x10e   :  { %v1594_v61 = vpop.f32.mrf.mxu0 }
 0x10f   :  { %v876_v62 = vrot.slane %v2420_v55, 1  ;;  %v669_v2 = vadd.f32 %v1593_v59, %v2362_v45  ;;  %v797_v3 = vmax.f32 %v761_v60, 0.0  ;;  %v828_v4 = vrot.slane %v2420_v55, 7 }
 0x110   :  { %v1595_v5 = vpop.f32.mrf.mxu0 }
 0x111   :  { %v766_v57 = vadd.f32 %v1731_v63, %v669_v2  ;;  %v2426_v35 = vmin.f32 %v797_v3, 20.0  ;;  %v1596_v20 = vadd.f32 %v1595_v5, %v1594_v61  ;;  %v891_v10 = vsel %vm2735_vm10, %v875_v52, %v876_v62 }
 0x112   :  { %v1597_v12 = vpop.f32.mrf.mxu0  ;;  %v1531_v14 = vpack.c.bf16 %v891_v10, %v892_v8 }
 0x113   :  { %v798_v17 = vmax.f32 %v766_v57, 0.0  ;;  %v672_v18 = vadd.f32 %v1596_v20, %v2362_v45  ;;  %v877_v19 = vrot.slane %v2426_v35, 1 }
 0x114   :  { %v1598_v28 = vpop.f32.mrf.mxu0  ;;  %1758 = vmatmul.mubr.msk.bf16.gmra.mxu0 %vm2134_vm15, %v1531_v14  ;;  %vm2737_vm15 = vmmov %vm2730_vm4 }
 0x115   :  { %v2434_v30 = vmin.f32 %v798_v17, 20.0  ;;  %v769_v63 = vadd.f32 %v1732_v32, %v672_v18  ;;  %v1599_v54 = vadd.f32 %v1598_v28, %v1597_v12  ;;  %v890_v13 = vsel %vm2736_vm11, %v876_v62, %v877_v19 }
 0x116   :  { %v1600_v34 = vpop.f32.mrf.mxu0 }
 0x117   :  { %v878_v39 = vrot.slane %v2434_v30, 1  ;;  %v799_v37 = vmax.f32 %v769_v63, 0.0  ;;  %v677_v7 = vadd.f32 %v1599_v54, %v2362_v45 }
 0x118   :  { %v1601_v44 = vpop.f32.mrf.mxu0 }
 0x119   :  { %v2440_v46 = vmin.f32 %v799_v37, 20.0  ;;  %v1602_v33 = vadd.f32 %v1601_v44, %v1600_v34  ;;  %v774_v49 = vadd.f32 %v773_v6, %v677_v7  ;;  %v889_v47 = vsel %vm2737_vm15, %v877_v19, %v878_v39 }
 0x11a   :  { %v1603_v32 = vpop.f32.mrf.mxu0  ;;  %v1534_v50 = vpack.c.bf16 %v889_v47, %v890_v13  ;;  %v821_v34 = vrot.slane %v2367_v56, 7  ;;  %v820_v7 = vrot.slane %v2369_v11, 7 }
 0x11b   :  { %v800_v51 = vmax.f32 %v774_v49, 0.0  ;;  %v680_v52 = vadd.f32 %v1602_v33, %v2362_v45  ;;  %v879_v41 = vrot.slane %v2440_v46, 1 }
 0x11c   :  { %v1604_v59 = vpop.f32.mrf.mxu0  ;;  %1761 = vmatprep.mubr.msk.bf16.mxu0 %vm2141_vm2, %v1534_v50  ;;  %vm2739_vm2 = vmmov %vm2730_vm4  ;;  %v850_v56 = vsel %vm291_vm0, %v820_v7, %v821_v34  ;;  %v822_v50 = vrot.slane %v2375_v25, 7 }
 0x11d   :  { %v2448_v60 = vmin.f32 %v800_v51, 20.0  ;;  %v1605_v61 = vadd.f32 %v1604_v59, %v1603_v32  ;;  %v777_v62 = vadd.f32 %v776_v48, %v680_v52  ;;  %v888_v20 = vsel %vm2738_vm5, %v878_v39, %v879_v41  ;;  %vm2740_vm9 = vmmov %vm2739_vm2 }
 0x11e   :  { %v1606_v2 = vpop.f32.mrf.mxu0  ;;  %vm2741_vm4 = vmmov %vm2739_vm2  ;;  %v920_v48 = vpack.c.bf16 %v2384_v24, %v2375_v25  ;;  %v848_v11 = vsel %vm291_vm0, %v822_v50, %v823_v22  ;;  %v825_v52 = vrot.slane %v2400_v29, 7  ;;  %v923_v24 = vpack.c.bf16 %v2400_v29, %v2392_v58 }
 0x11f   :  { %v880_v3 = vrot.slane %v2448_v60, 1  ;;  %v685_v5 = vadd.f32 %v1605_v61, %v2362_v45  ;;  %v801_v8 = vmax.f32 %v777_v62, 0.0  ;;  %vm2743_vm10 = vmmov %vm2739_vm2  ;;  %v847_v25 = vsel %vm291_vm0, %v823_v22, %v824_v1  ;;  %v1819_v22 = vld [vmem:[%s2682_s0 + $0x8] sm:$0xff] }
 0x120   :  { %v1607_v57 = vpop.f32.mrf.mxu0  ;;  %v846_v27 = vsel %vm291_vm0, %v824_v1, %v825_v52  ;;  %v827_v59 = vrot.slane %v2412_v40, 7  ;;  %v926_v61 = vpack.c.bf16 %v2412_v40, %v2406_v23  ;;  %v845_v29 = vsel %vm291_vm0, %v825_v52, %v826_v36 }
 0x121   :  { %v782_v10 = vadd.f32 %v1735_v0, %v685_v5  ;;  %v2454_v12 = vmin.f32 %v801_v8, 20.0  ;;  %v1608_v14 = vadd.f32 %v1607_v57, %v1606_v2  ;;  %v887_v53 = vsel %vm2739_vm2, %v879_v41, %v880_v3 }
 0x122   :  { %v1537_v6 = vpack.c.bf16 %v887_v53, %v888_v20  ;;  %v1504_v41 = vpack.c.bf16 %v846_v27, %v847_v25  ;;  %v844_v58 = vsel %vm291_vm0, %v826_v36, %v827_v59  ;;  %v829_v2 = vrot.slane %v2426_v35, 7 }
 0x123   :  { %v802_v17 = vmax.f32 %v782_v10, 0.0  ;;  %v688_v18 = vadd.f32 %v1608_v14, %v2362_v45  ;;  %v881_v28 = vrot.slane %v2454_v12, 1  ;;  %v1507_v62 = vpack.c.bf16 %v844_v58, %v845_v29 }
 0x124   :  { %1762 = vmatmul.mubr.msk.bf16.gmra.mxu0 %vm2184_vm12, %v1537_v6  ;;  %vm2742_vm12 = vmmov %vm2739_vm2  ;;  %v842_v23 = vsel %vm291_vm0, %v828_v4, %v829_v2  ;;  %v843_v40 = vsel %vm291_vm0, %v827_v59, %v828_v4  ;;  %v831_v8 = vrot.slane %v2440_v46, 7  ;;  %v932_v57 = vpack.c.bf16 %v2440_v46, %v2434_v30 }
 0x125   :  { %v2461_v19 = vmin.f32 %v802_v17, 20.0  ;;  %v785_v63 = vadd.f32 %v1736_v38, %v688_v18  ;;  %v886_v45 = vsel %vm2741_vm4, %v880_v3, %v881_v28  ;;  %v929_v3 = vpack.c.bf16 %v2426_v35, %v2420_v55 }
 0x126   :  { %v1510_v5 = vpack.c.bf16 %v842_v23, %v843_v40  ;;  %v833_v10 = vrot.slane %v2454_v12, 7  ;;  %v935_v14 = vpack.c.bf16 %v2454_v12, %v2448_v60 }
 0x127   :  { %v882_v0 = vrot.slane %v2461_v19, 1  ;;  %v803_v54 = vmax.f32 %v785_v63, 0.0  ;;  %v834_v12 = vrot.slane %v2461_v19, 7 }
 0x129   :  { %v2466_v39 = vmin.f32 %v803_v54, 20.0  ;;  %v885_v37 = vsel %vm2740_vm9, %v881_v28, %v882_v0 }
 0x12a   :  { %v1540_v16 = vpack.c.bf16 %v885_v37, %v886_v45 }
 0x12b   :  { %v835_v44 = vrot.slane %v2466_v39, 7  ;;  %v883_v38 = vrot.slane %v2466_v39, 1  ;;  %v938_v6 = vpack.c.bf16 %v2466_v39, %v2461_v19 }
 0x12c   :  { %1765 = vmatprep.mubr.msk.bf16.mxu0 %vm2194_vm14, %v1540_v16 }
 0x12d   :  { %v851_v13 = vsel %vm291_vm0, %v835_v44, %v820_v7  ;;  %v884_v33 = vsel %vm2742_vm12, %v882_v0, %v883_v38  ;;  %v899_v49 = vsel %vm2743_vm10, %v883_v38, %v868_v26  ;;  %v849_v26 = vsel %vm291_vm0, %v821_v34, %v822_v50 }
 0x12e   :  { %v1498_v47 = vpack.c.bf16 %v850_v56, %v851_v13  ;;  %v1543_v32 = vpack.c.bf16 %v899_v49, %v884_v33  ;;  %v1501_v51 = vpack.c.bf16 %v848_v11, %v849_v26 }
 0x130   :  { %1499 = vmatmul.mubr.msk.bf16.vlgmr.msra.gmra.mxu1 %vm2029_vm7, %v1498_v47  ;;  %1766 = vmatmul.mubr.msk.bf16.gmra.mxu0 %vm2221_vm1, %v1543_v32  ;;  %vm2744_vm1 = vnez %v2719_v31  ;;  %vm2745_vm7 = vnez %v2723_v43  ;;  %v830_v31 = vrot.slane %v2434_v30, 7  ;;  %v832_v43 = vrot.slane %v2448_v60, 7 }
 0x131   :  { %1177 = vmatprep.mubr.bf16.mxu1 %v920_v48  ;;  %v837_v60 = vsel %vm291_vm0, %v833_v10, %v834_v12 }
 0x132   :  { %v840_v55 = vsel %vm291_vm0, %v830_v31, %v831_v8  ;;  %v841_v35 = vsel %vm291_vm0, %v829_v2, %v830_v31  ;;  %v838_v30 = vsel %vm291_vm0, %v832_v43, %v833_v10  ;;  %v839_v46 = vsel %vm291_vm0, %v831_v8, %v832_v43 }
 0x133   :  { %v1513_v20 = vpack.c.bf16 %v840_v55, %v841_v35  ;;  %v1516_v53 = vpack.c.bf16 %v838_v30, %v839_v46 }
 0x138   :  { %1502 = vmatmul.mubr.msk.bf16.gmra.mxu1 %vm2104_vm13, %v1501_v51  ;;  %vm2746_vm13 = vnez %v2725_v21  ;;  %v836_v21 = vsel %vm291_vm0, %v834_v12, %v835_v44 }
 0x139   :  { %1185 = vmatprep.mubr.bf16.mxu1 %v923_v24  ;;  %v1519_v17 = vpack.c.bf16 %v836_v21, %v837_v60 }
 0x140   :  { %1505 = vmatmul.mubr.msk.bf16.gmra.mxu1 %vm2171_vm6, %v1504_v41 }
 0x141   :  { %1193 = vmatprep.mubr.bf16.mxu1 %v926_v61 }
 0x148   :  { %1508 = vmatmul.mubr.msk.bf16.gmra.mxu1 %vm2744_vm1, %v1507_v62 }
 0x149   :  { %1201 = vmatprep.mubr.bf16.mxu1 %v929_v3 }
 0x150   :  { %1511 = vmatmul.mubr.msk.bf16.gmra.mxu1 %vm2745_vm7, %v1510_v5 }
 0x151   :  { %1209 = vmatprep.mubr.bf16.mxu1 %v932_v57 }
 0x158   :  { %1514 = vmatmul.mubr.msk.bf16.gmra.mxu1 %vm2746_vm13, %v1513_v20 }
 0x159   :  { %1217 = vmatprep.mubr.bf16.mxu1 %v935_v14 }
 0x160   :  { %1517 = vmatmul.mubr.msk.bf16.gmra.mxu1 %vm2265_vm8, %v1516_v53 }
 0x161   :  { %1225 = vmatprep.mubr.bf16.mxu1 %v938_v6 }
 0x168   :  { %1520 = vmatmul.mubr.msk.bf16.gmra.mxu1 %vm2281_vm3, %v1519_v17 }
 0x1c4   :  { %v1755_v18 = vpop.f32.mrf.mxu0 }
 0x1c6   :  { %v1268_v63 = vpop.f32.mrf.mxu0 }
 0x1c8   :  { %v1756_v39 = vpop.f32.mrf.mxu0 }
 0x1ca   :  { %v1271_v38 = vpop.f32.mrf.mxu0 }
 0x1d4   :  { %v1759_v11 = vpop.f32.mrf.mxu0 }
 0x1d6   :  { %v1284_v61 = vpop.f32.mrf.mxu0 }
 0x1d8   :  { %v1760_v5 = vpop.f32.mrf.mxu0 }
 0x1da   :  { %v1287_v30 = vpop.f32.mrf.mxu0 }
 0x1f0   :  { %v1641_v28 = vpop.f32.mrf.mxu1 }
 0x1f2   :  { %v1642_v19 = vpop.f32.mrf.mxu1 }
 0x1f3   :  { %v1643_v0 = vadd.f32 %v1642_v19, %v1641_v28 }
 0x1f4   :  { %v1644_v54 = vpop.f32.mrf.mxu1 }
 0x1f5   :  { %v1172_v34 = vadd.f32 %v1643_v0, %v2567_v42 }
 0x1f6   :  { %v1645_v15 = vpop.f32.mrf.mxu1 }
 0x1f7   :  { %v1269_v37 = vadd.f32 %v1268_v63, %v1172_v34  ;;  %v1646_v45 = vadd.f32 %v1645_v15, %v1644_v54  ;;  %v1763_v63 = vpop.f32.mrf.mxu0 }
 0x1f8   :  { %v1647_v16 = vpop.f32.mrf.mxu1 }
 0x1f9   :  { %v1331_v7 = vadd.f32 %v1818_v9, %v1269_v37  ;;  %v1175_v44 = vadd.f32 %v1646_v45, %v2567_v42  ;;  %v1300_v9 = vpop.f32.mrf.mxu0 }
 0x1fa   :  { %v1648_v56 = vpop.f32.mrf.mxu1 }
 0x1fb   :  { %v1347_v13 = vmax.f32 %v1331_v7, 0.0  ;;  %v1272_v33 = vadd.f32 %v1271_v38, %v1175_v44  ;;  %v1649_v49 = vadd.f32 %v1648_v56, %v1647_v16 }
 0x1fc   :  { %v1650_v47 = vpop.f32.mrf.mxu1 }
 0x1fd   :  { %v1363_v32 = vmin.f32 %v1347_v13, 20.0  ;;  %v1332_v48 = vadd.f32 %v1819_v22, %v1272_v33  ;;  %v1180_v50 = vadd.f32 %v1649_v49, %v2567_v42  ;;  %v1764_v22 = vpop.f32.mrf.mxu0 }
 0x1fe   :  { %v1651_v26 = vpop.f32.mrf.mxu1 }
 0x1ff   :  { %1379 = vst [vmem:[%s2685_s4] sm:$0xff] %v1363_v32  ;;  %v1348_v51 = vmax.f32 %v1332_v48, 0.0  ;;  %v1277_v52 = vadd.f32 %v1755_v18, %v1180_v50  ;;  %v1652_v24 = vadd.f32 %v1651_v26, %v1650_v47 }
 0x200   :  { %v1653_v1 = vpop.f32.mrf.mxu1 }
 0x201   :  { %v1364_v27 = vmin.f32 %v1348_v51, 20.0  ;;  %v1183_v59 = vadd.f32 %v1652_v24, %v2567_v42 }
 0x202   :  { %v1654_v36 = vpop.f32.mrf.mxu1 }
 0x203   :  { %v1280_v29 = vadd.f32 %v1756_v39, %v1183_v59  ;;  %v1655_v62 = vadd.f32 %v1654_v36, %v1653_v1 }
 0x204   :  { %v1656_v2 = vpop.f32.mrf.mxu1 }
 0x205   :  { %v1188_v40 = vadd.f32 %v1655_v62, %v2567_v42 }
 0x206   :  { %v1820_v25 = vld [vmem:[%s2682_s0 + $0x10] sm:$0xff]  ;;  %v1657_v8 = vpop.f32.mrf.mxu1 }
 0x207   :  { %v1333_v41 = vadd.f32 %v1820_v25, %v1277_v52  ;;  %1380 = vst [vmem:[%s2685_s4 + $0x8] sm:$0xff] %v1364_v27  ;;  %v1285_v31 = vadd.f32 %v1284_v61, %v1188_v40  ;;  %v1658_v55 = vadd.f32 %v1657_v8, %v1656_v2  ;;  %v1303_v25 = vpop.f32.mrf.mxu0 }
 0x208   :  { %v1659_v35 = vpop.f32.mrf.mxu1 }
 0x209   :  { %v1349_v58 = vmax.f32 %v1333_v41, 0.0  ;;  %v1191_v43 = vadd.f32 %v1658_v55, %v2567_v42 }
 0x20a   :  { %v1660_v46 = vpop.f32.mrf.mxu1 }
 0x20b   :  { %v1365_v3 = vmin.f32 %v1349_v58, 20.0  ;;  %v1288_v6 = vadd.f32 %v1287_v30, %v1191_v43  ;;  %v1661_v12 = vadd.f32 %v1660_v46, %v1659_v35 }
 0x20c   :  { %v1662_v21 = vpop.f32.mrf.mxu1 }
 0x20d   :  { %v1196_v28 = vadd.f32 %v1661_v12, %v2567_v42 }
 0x20e   :  { %v1821_v4 = vld [vmem:[%s2682_s0 + $0x18] sm:$0xff]  ;;  %v1663_v19 = vpop.f32.mrf.mxu1 }
 0x20f   :  { %v1334_v23 = vadd.f32 %v1821_v4, %v1280_v29  ;;  %1381 = vst [vmem:[%s2685_s4 + $0x10] sm:$0xff] %v1365_v3  ;;  %v1293_v54 = vadd.f32 %v1759_v11, %v1196_v28  ;;  %v1664_v34 = vadd.f32 %v1663_v19, %v1662_v21  ;;  %v1767_v4 = vpop.f32.mrf.mxu0 }
 0x210   :  { %v1665_v39 = vpop.f32.mrf.mxu1 }
 0x211   :  { %v1350_v57 = vmax.f32 %v1334_v23, 0.0  ;;  %v1199_v16 = vadd.f32 %v1664_v34, %v2567_v42 }
 0x212   :  { %v1666_v7 = vpop.f32.mrf.mxu1 }
 0x213   :  { %v1366_v20 = vmin.f32 %v1350_v57, 20.0  ;;  %v1296_v38 = vadd.f32 %v1760_v5, %v1199_v16  ;;  %v1667_v56 = vadd.f32 %v1666_v7, %v1665_v39 }
 0x214   :  { %v1668_v13 = vpop.f32.mrf.mxu1 }
 0x215   :  { %v1204_v32 = vadd.f32 %v1667_v56, %v2567_v42 }
 0x216   :  { %v1822_v10 = vld [vmem:[%s2682_s0 + $0x20] sm:$0xff]  ;;  %v1669_v48 = vpop.f32.mrf.mxu1 }
 0x217   :  { %v1335_v14 = vadd.f32 %v1822_v10, %v1285_v31  ;;  %1382 = vst [vmem:[%s2685_s4 + $0x18] sm:$0xff] %v1366_v20  ;;  %v1301_v11 = vadd.f32 %v1300_v9, %v1204_v32  ;;  %v1670_v26 = vadd.f32 %v1669_v48, %v1668_v13  ;;  %v1316_v10 = vpop.f32.mrf.mxu0 }
 0x218   :  { %v1671_v51 = vpop.f32.mrf.mxu1 }
 0x219   :  { %v1351_v53 = vmax.f32 %v1335_v14, 0.0  ;;  %v1207_v27 = vadd.f32 %v1670_v26, %v2567_v42 }
 0x21a   :  { %v1672_v41 = vpop.f32.mrf.mxu1 }
 0x21b   :  { %v1367_v60 = vmin.f32 %v1351_v53, 20.0  ;;  %v1304_v61 = vadd.f32 %v1303_v25, %v1207_v27  ;;  %v1673_v36 = vadd.f32 %v1672_v41, %v1671_v51 }
 0x21c   :  { %v1674_v58 = vpop.f32.mrf.mxu1 }
 0x21d   :  { %v1212_v3 = vadd.f32 %v1673_v36, %v2567_v42 }
 0x21e   :  { %v1823_v17 = vld [vmem:[%s2682_s0 + $0x28] sm:$0xff]  ;;  %v1675_v23 = vpop.f32.mrf.mxu1 }
 0x21f   :  { %v1336_v18 = vadd.f32 %v1823_v17, %v1288_v6  ;;  %1383 = vst [vmem:[%s2685_s4 + $0x20] sm:$0xff] %v1367_v60  ;;  %v1309_v5 = vadd.f32 %v1763_v63, %v1212_v3  ;;  %v1676_v8 = vadd.f32 %v1675_v23, %v1674_v58  ;;  %v1768_v17 = vpop.f32.mrf.mxu0 }
 0x220   :  { %v1677_v57 = vpop.f32.mrf.mxu1 }
 0x221   :  { %v1352_v0 = vmax.f32 %v1336_v18, 0.0  ;;  %v1215_v20 = vadd.f32 %v1676_v8, %v2567_v42 }
 0x222   :  { %v1678_v14 = vpop.f32.mrf.mxu1 }
 0x223   :  { %v1368_v15 = vmin.f32 %v1352_v0, 20.0  ;;  %v1312_v30 = vadd.f32 %v1764_v22, %v1215_v20  ;;  %v1679_v46 = vadd.f32 %v1678_v14, %v1677_v57 }
 0x224   :  { %v1680_v53 = vpop.f32.mrf.mxu1 }
 0x225   :  { %v1220_v60 = vadd.f32 %v1679_v46, %v2567_v42 }
 0x226   :  { %v1824_v37 = vld [vmem:[%s2682_s0 + $0x30] sm:$0xff]  ;;  %v1681_v18 = vpop.f32.mrf.mxu1 }
 0x227   :  { %v1337_v45 = vadd.f32 %v1824_v37, %v1293_v54  ;;  %1384 = vst [vmem:[%s2685_s4 + $0x28] sm:$0xff] %v1368_v15  ;;  %v1317_v63 = vadd.f32 %v1316_v10, %v1220_v60  ;;  %v1682_v19 = vadd.f32 %v1681_v18, %v1680_v53  ;;  %v1319_v37 = vpop.f32.mrf.mxu0 }
 0x228   :  { %v1683_v0 = vpop.f32.mrf.mxu1 }
 0x229   :  { %v1353_v44 = vmax.f32 %v1337_v45, 0.0  ;;  %v1223_v15 = vadd.f32 %v1682_v19, %v2567_v42 }
 0x22a   :  { %v1684_v45 = vpop.f32.mrf.mxu1 }
 0x22b   :  { %v1369_v33 = vmin.f32 %v1353_v44, 20.0  ;;  %v1320_v9 = vadd.f32 %v1319_v37, %v1223_v15  ;;  %v1685_v7 = vadd.f32 %v1684_v45, %v1683_v0 }
 0x22c   :  { %v1686_v44 = vpop.f32.mrf.mxu1 }
 0x22e   :  { %v1825_v49 = vld [vmem:[%s2682_s0 + $0x38] sm:$0xff] }
 0x22f   :  { %v1338_v47 = vadd.f32 %v1825_v49, %v1296_v38  ;;  %1385 = vst [vmem:[%s2685_s4 + $0x30] sm:$0xff] %v1369_v33  ;;  %v1228_v33 = vadd.f32 %v1685_v7, %v2567_v42  ;;  %v1687_v49 = vpop.f32.mrf.mxu1 }
 0x230   :  { %v1688_v22 = vadd.f32 %v1687_v49, %v1686_v44 }
 0x231   :  { %v1354_v50 = vmax.f32 %v1338_v47, 0.0  ;;  %v1325_v32 = vadd.f32 %v1767_v4, %v1228_v33 }
 0x232   :  { %v1231_v26 = vadd.f32 %v1688_v22, %v2567_v42 }
 0x233   :  { %v1370_v52 = vmin.f32 %v1354_v50, 20.0 }
 0x236   :  { %v1826_v24 = vld [vmem:[%s2682_s0 + $0x40] sm:$0xff] }
 0x237   :  { %v1339_v1 = vadd.f32 %v1826_v24, %v1301_v11  ;;  %1386 = vst [vmem:[%s2685_s4 + $0x38] sm:$0xff] %v1370_v52  ;;  %v1328_v52 = vadd.f32 %v1768_v17, %v1231_v26 }
 0x239   :  { %v1355_v59 = vmax.f32 %v1339_v1, 0.0 }
 0x23b   :  { %v1371_v29 = vmin.f32 %v1355_v59, 20.0 }
 0x23e   :  { %v1827_v62 = vld [vmem:[%s2682_s0 + $0x48] sm:$0xff] }
 0x23f   :  { %v1340_v2 = vadd.f32 %v1827_v62, %v1304_v61  ;;  %1387 = vst [vmem:[%s2685_s4 + $0x40] sm:$0xff] %v1371_v29 }
 0x241   :  { %v1356_v40 = vmax.f32 %v1340_v2, 0.0 }
 0x243   :  { %v1372_v31 = vmin.f32 %v1356_v40, 20.0 }
 0x246   :  { %v1828_v55 = vld [vmem:[%s2682_s0 + $0x50] sm:$0xff] }
 0x247   :  { %v1341_v35 = vadd.f32 %v1828_v55, %v1309_v5  ;;  %1388 = vst [vmem:[%s2685_s4 + $0x48] sm:$0xff] %v1372_v31 }
 0x249   :  { %v1357_v43 = vmax.f32 %v1341_v35, 0.0 }
 0x24b   :  { %v1373_v6 = vmin.f32 %v1357_v43, 20.0 }
 0x24e   :  { %v1829_v12 = vld [vmem:[%s2682_s0 + $0x58] sm:$0xff] }
 0x24f   :  { %v1342_v21 = vadd.f32 %v1829_v12, %v1312_v30  ;;  %1389 = vst [vmem:[%s2685_s4 + $0x50] sm:$0xff] %v1373_v6 }
 0x251   :  { %v1358_v28 = vmax.f32 %v1342_v21, 0.0 }
 0x253   :  { %v1374_v54 = vmin.f32 %v1358_v28, 20.0 }
 0x256   :  { %v1830_v34 = vld [vmem:[%s2682_s0 + $0x60] sm:$0xff] }
 0x257   :  { %v1343_v39 = vadd.f32 %v1830_v34, %v1317_v63  ;;  %1390 = vst [vmem:[%s2685_s4 + $0x58] sm:$0xff] %v1374_v54 }
 0x259   :  { %v1359_v16 = vmax.f32 %v1343_v39, 0.0 }
 0x25b   :  { %v1375_v38 = vmin.f32 %v1359_v16, 20.0 }
 0x25e   :  { %v1831_v56 = vld [vmem:[%s2682_s0 + $0x68] sm:$0xff] }
 0x25f   :  { %v1344_v13 = vadd.f32 %v1831_v56, %v1320_v9  ;;  %1391 = vst [vmem:[%s2685_s4 + $0x60] sm:$0xff] %v1375_v38 }
 0x261   :  { %v1360_v47 = vmax.f32 %v1344_v13, 0.0 }
 0x263   :  { %v1376_v48 = vmin.f32 %v1360_v47, 20.0 }
 0x266   :  { %v1832_v50 = vld [vmem:[%s2682_s0 + $0x70] sm:$0xff] }
 0x267   :  { %v1345_v11 = vadd.f32 %v1832_v50, %v1325_v32  ;;  %1392 = vst [vmem:[%s2685_s4 + $0x68] sm:$0xff] %v1376_v48 }
 0x269   :  { %v1361_v51 = vmax.f32 %v1345_v11, 0.0 }
 0x26b   :  { %v1377_v24 = vmin.f32 %v1361_v51, 20.0 }
 0x26e   :  { %v1833_v1 = vld [vmem:[%s2682_s0 + $0x78] sm:$0xff] }
 0x26f   :  { %v1346_v27 = vadd.f32 %v1833_v1, %v1328_v52  ;;  %1393 = vst [vmem:[%s2685_s4 + $0x70] sm:$0xff] %v1377_v24 }
 0x271   :  { %v1362_v25 = vmax.f32 %v1346_v27, 0.0 }
 0x273   :  { %v1378_v41 = vmin.f32 %v1362_v25, 20.0 }
 0x275   :  { %1394 = vst [vmem:[%s2685_s4 + $0x78] sm:$0xff] %v1378_v41 }

</bundles_post_ra>
